<compile_context>
chip_gen: v7x
topology: tpu7x:2x2x1
jax: 0.10.0
libtpu: 0.0.40
codegen_flags: <defaults>
</compile_context>

<pallas_src>
import functools

import jax
import jax.numpy as jnp
from jax.experimental import pallas as pl
from jax.experimental.pallas import tpu as pltpu


LANE = 128


def _round_up(n, m):
    return (n + m - 1) // m * m


# ------------------------------ kernel ------------------------------------ #

def _encoder_kernel(n_hidden, *refs):
    """Fused MLP: n_hidden x (Linear[+folded BN] -> LeakyReLU(0.2)) -> Linear."""
    x_ref, out_ref = refs[0], refs[-1]
    p = refs[1:-1]                           # flattened (w, b) per layer

    h = x_ref[...]                           # bf16 activations feed the MXU
    for li in range(n_hidden):
        w_ref, b_ref = p[2 * li], p[2 * li + 1]
        z = jnp.dot(h, w_ref[...], preferred_element_type=jnp.float32)
        z = z + b_ref[...]                   # f32 bias (BN already folded in)
        z = jnp.where(z > 0.0, z, 0.2 * z)   # LeakyReLU(0.2) in f32 on the VPU
        h = z.astype(h.dtype)                # back to compute dtype for next MXU pass
        # Dropout: identity in eval mode.

    w_ref, b_ref = p[-2], p[-1]
    out = jnp.dot(h, w_ref[...], preferred_element_type=jnp.float32) + b_ref[...]
    out_ref[...] = out.astype(out_ref.dtype)


# ------------------------------ wrapper ------------------------------------ #

def encoder_forward(x, padded_params, latent_dim, *, batch_tile=128,
                    compute_dtype=jnp.bfloat16, out_dtype=jnp.float32):
    """Run the fused encoder kernel, tiled over the batch dimension."""
    n_layers = len(padded_params)
    n_hidden = n_layers - 1
    B, d_in = x.shape
    d_out_p = padded_params[-1][0].shape[1]

    # Ragged batch: zero-pad to a multiple of batch_tile, slice afterwards.
    grid_b = pl.cdiv(B, batch_tile)
    B_pad = grid_b * batch_tile
    x_c = x.astype(compute_dtype)
    if B_pad != B:
        x_c = jnp.pad(x_c, ((0, B_pad - B), (0, 0)))

    # Weights/biases are grid-invariant (block index (0, 0) for every step):
    # Pallas keeps them resident in VMEM and does not re-DMA them per step.
    const = lambda shape: pl.BlockSpec(shape, lambda i: (0, 0))
    in_specs = [pl.BlockSpec((batch_tile, d_in), lambda i: (i, 0))]
    flat_params = []
    for w, b in padded_params:
        in_specs.append(const(w.shape))
        in_specs.append(const(b.shape))
        flat_params += [w, b]

    # Explicit VMEM budget (double-buffered x/out tiles + resident weights),
    # with generous headroom.
    param_bytes = sum(int(a.size) * a.dtype.itemsize for a in flat_params)
    tile_bytes = (batch_tile * d_in * x_c.dtype.itemsize
                  + batch_tile * d_out_p * jnp.dtype(out_dtype).itemsize)
    vmem_limit = int(min(100 * 2**20, max(32 * 2**20, 4 * (param_bytes + tile_bytes))))

    grid_spec = pltpu.PrefetchScalarGridSpec(
        num_scalar_prefetch=0,
        grid=(grid_b,),
        in_specs=in_specs,
        out_specs=pl.BlockSpec((batch_tile, d_out_p), lambda i: (i, 0)),
    )

    out = pl.pallas_call(
        functools.partial(_encoder_kernel, n_hidden),
        out_shape=jax.ShapeDtypeStruct((B_pad, d_out_p), out_dtype),
        grid_spec=grid_spec,
        compiler_params=pltpu.CompilerParams(
            dimension_semantics=("parallel",),
            vmem_limit_bytes=vmem_limit,
        ),
    )(x_c, *flat_params)

    return out[:B, :latent_dim]


# --------------------------- parameter plumbing ----------------------------- #

def init_raw_params(key, input_dim, hidden_dims, latent_dim):
    """Torch-like params: per hidden layer (w, b, gamma, beta, mean, var) plus the
    final projection (w, b). Weights are stored [in, out] (transpose of torch)."""
    dims = [input_dim] + list(hidden_dims)
    keys = iter(jax.random.split(key, 6 * len(hidden_dims) + 2))
    hidden = []
    for li in range(len(hidden_dims)):
        fan_in, fan_out = dims[li], dims[li + 1]
        bound = 1.0 / (fan_in ** 0.5)
        w = jax.random.uniform(next(keys), (fan_in, fan_out), jnp.float32, -bound, bound)
        b = jax.random.uniform(next(keys), (fan_out,), jnp.float32, -bound, bound)
        gamma = 1.0 + 0.1 * jax.random.normal(next(keys), (fan_out,), jnp.float32)
        beta = 0.1 * jax.random.normal(next(keys), (fan_out,), jnp.float32)
        mean = 0.05 * jax.random.normal(next(keys), (fan_out,), jnp.float32)
        var = 1.0 + 0.2 * jax.random.uniform(next(keys), (fan_out,), jnp.float32)
        hidden.append((w, b, gamma, beta, mean, var))
    fan_in = dims[-1]
    bound = 1.0 / (fan_in ** 0.5)
    w_out = jax.random.uniform(next(keys), (fan_in, latent_dim), jnp.float32, -bound, bound)
    b_out = jax.random.uniform(next(keys), (latent_dim,), jnp.float32, -bound, bound)
    return hidden, (w_out, b_out)


def fold_and_pad_params(raw, *, lane=LANE, compute_dtype=jnp.bfloat16, eps=1e-5):
    """Fold eval-mode BatchNorm into each Linear, then zero-pad output dims (and the
    next layer's matching input dim) to multiples of `lane`. Zero padding is exact."""
    hidden, (w_out, b_out) = raw
    folded = []
    for w, b, gamma, beta, mean, var in hidden:
        scale = gamma / jnp.sqrt(var + eps)
        w_f = w * scale[None, :]
        b_f = b * scale + (beta - mean * scale)
        folded.append((w_f, b_f))
    folded.append((w_out, b_out))

    padded = []
    row_pad = 0   # rows of zero padding so in-dim matches previous padded out-dim
    for w, b in folded:
        d_out = w.shape[1]
        col_pad = _round_up(d_out, lane) - d_out
        w_p = jnp.pad(w, ((0, row_pad), (0, col_pad))).astype(compute_dtype)
        b_p = jnp.pad(b.reshape(1, -1), ((0, 0), (0, col_pad))).astype(jnp.float32)
        padded.append((w_p, b_p))
        row_pad = col_pad
    return padded


# ------------------------------ references ---------------------------------- #

def encoder_reference_mirror(x, padded_params, latent_dim, compute_dtype=jnp.bfloat16):
    """Plain-JAX mirror of the kernel math (same bf16/f32 mix) for a tight check."""
    h = x.astype(compute_dtype)
    n = len(padded_params)
    z = None
    for li, (w, b) in enumerate(padded_params):
        z = jnp.dot(h, w, preferred_element_type=jnp.float32) + b
        if li < n - 1:
            z = jnp.where(z > 0.0, z, 0.2 * z)
            h = z.astype(compute_dtype)
    return z[:, :latent_dim]


def encoder_reference_f32(x, raw, eps=1e-5):
    """Full-f32 eval-mode reference straight from the torch module definition."""
    hidden, (w_out, b_out) = raw
    h = x
    for w, b, gamma, beta, mean, var in hidden:
        z = h @ w + b
        z = (z - mean) / jnp.sqrt(var + eps) * gamma + beta
        h = jnp.where(z > 0.0, z, 0.2 * z)       # LeakyReLU(0.2); dropout = identity
    return h @ w_out + b_out


# --------------------------------- main -------------------------------------- #

if __name__ == "__main__":
    key = jax.random.PRNGKey(0)
    kx, kp = jax.random.split(key)

    # Small shapes consistent with the module: input_dim=32, hidden_dims=[64, 32],
    # latent_dim=16. Batch 200 exercises both grid steps and the ragged-batch path.
    B, input_dim, hidden_dims, latent_dim = 200, 32, [64, 32], 16
    x = jax.random.normal(kx, (B, input_dim), jnp.float32)

    raw = init_raw_params(kp, input_dim, hidden_dims, latent_dim)
    padded = fold_and_pad_params(raw, compute_dtype=jnp.bfloat16)

    out = encoder_forward(x, padded, latent_dim, batch_tile=128)
    out = jax.block_until_ready(out)
    assert out.shape == (B, latent_dim)

    # Tight check vs. a plain-JAX mirror of the kernel math (same precision mix).
    ref_mirror = encoder_reference_mirror(x, padded, latent_dim)
    assert jnp.allclose(out, ref_mirror, atol=2e-2, rtol=2e-2), "mismatch vs mirrored ref"

    # Loose check vs. full-f32 eval-mode torch semantics (bf16 quantization only).
    ref_f32 = encoder_reference_f32(x, raw)
    assert jnp.allclose(out, ref_f32, atol=1e-1, rtol=1e-1), "mismatch vs f32 reference"

    # TODO(synk): training-mode BatchNorm (batch statistics) and stochastic Dropout
    # are not implemented; the kernel reproduces eval-mode forward semantics.
    print("KERNEL_OK")
</pallas_src>

<mosaic_0001>
module attributes {stable_mosaic.version = 11 : i64} {
  func.func @_encoder_kernel(%arg0: i32, %arg1: memref<128x32xbf16, #tpu.memory_space<vmem>>, %arg2: memref<32x128xbf16, #tpu.memory_space<vmem>>, %arg3: memref<1x128xf32, #tpu.memory_space<vmem>>, %arg4: memref<128x128xbf16, #tpu.memory_space<vmem>>, %arg5: memref<1x128xf32, #tpu.memory_space<vmem>>, %arg6: memref<128x128xbf16, #tpu.memory_space<vmem>>, %arg7: memref<1x128xf32, #tpu.memory_space<vmem>>, %arg8: memref<128x128xf32, #tpu.memory_space<vmem>>) attributes {dimension_semantics = [#tpu.dimension_semantics<parallel>], iteration_bounds = array<i64: 2>, scalar_prefetch = 0 : i64, scratch_operands = 0 : i64, tpu.core_type = #tpu.core_type<tc>, window_params = [{transform_indices = @transform_0, window_bounds = array<i64: 128, 32>}, {pipeline_mode = #tpu.pipeline_mode<synchronous>, transform_indices = @transform_1, window_bounds = array<i64: 32, 128>}, {pipeline_mode = #tpu.pipeline_mode<synchronous>, transform_indices = @transform_2, window_bounds = array<i64: 1, 128>}, {pipeline_mode = #tpu.pipeline_mode<synchronous>, transform_indices = @transform_3, window_bounds = array<i64: 128, 128>}, {pipeline_mode = #tpu.pipeline_mode<synchronous>, transform_indices = @transform_4, window_bounds = array<i64: 1, 128>}, {pipeline_mode = #tpu.pipeline_mode<synchronous>, transform_indices = @transform_5, window_bounds = array<i64: 128, 128>}, {pipeline_mode = #tpu.pipeline_mode<synchronous>, transform_indices = @transform_6, window_bounds = array<i64: 1, 128>}, {transform_indices = @transform_7, window_bounds = array<i64: 128, 128>}]} {
    %c0 = arith.constant 0 : index
    %c0_0 = arith.constant 0 : index
    %0 = vector.load %arg1[%c0, %c0_0] : memref<128x32xbf16, #tpu.memory_space<vmem>>, vector<128x32xbf16>
    %c0_1 = arith.constant 0 : index
    %c0_2 = arith.constant 0 : index
    %1 = vector.load %arg2[%c0_1, %c0_2] : memref<32x128xbf16, #tpu.memory_space<vmem>>, vector<32x128xbf16>
    %cst = arith.constant dense<0.000000e+00> : vector<128x128xf32>
    %2 = tpu.matmul %0, %1, %cst {dimension_numbers = #tpu.dot_dimension_numbers<[1], [0], [0], [1], [0, 0, 1, 1], [], []>} : vector<128x32xbf16>, vector<32x128xbf16>, vector<128x128xf32> -> vector<128x128xf32>
    %c0_3 = arith.constant 0 : index
    %c0_4 = arith.constant 0 : index
    %3 = vector.load %arg3[%c0_3, %c0_4] : memref<1x128xf32, #tpu.memory_space<vmem>>, vector<1x128xf32>
    %4 = vector.broadcast %3 : vector<1x128xf32> to vector<128x128xf32>
    %5 = arith.addf %2, %4 : vector<128x128xf32>
    %cst_5 = arith.constant 0.000000e+00 : f32
    %6 = vector.broadcast %cst_5 : f32 to vector<128x128xf32>
    %7 = arith.cmpf ogt, %5, %6 : vector<128x128xf32>
    %cst_6 = arith.constant 2.000000e-01 : f32
    %8 = vector.broadcast %cst_6 : f32 to vector<128x128xf32>
    %9 = arith.mulf %8, %5 : vector<128x128xf32>
    %10 = arith.select %7, %5, %9 : vector<128x128xi1>, vector<128x128xf32>
    %11 = arith.truncf %10 : vector<128x128xf32> to vector<128x128xbf16>
    %c0_7 = arith.constant 0 : index
    %c0_8 = arith.constant 0 : index
    %12 = vector.load %arg4[%c0_7, %c0_8] : memref<128x128xbf16, #tpu.memory_space<vmem>>, vector<128x128xbf16>
    %cst_9 = arith.constant dense<0.000000e+00> : vector<128x128xf32>
    %13 = tpu.matmul %11, %12, %cst_9 {dimension_numbers = #tpu.dot_dimension_numbers<[1], [0], [0], [1], [0, 0, 1, 1], [], []>} : vector<128x128xbf16>, vector<128x128xbf16>, vector<128x128xf32> -> vector<128x128xf32>
    %c0_10 = arith.constant 0 : index
    %c0_11 = arith.constant 0 : index
    %14 = vector.load %arg5[%c0_10, %c0_11] : memref<1x128xf32, #tpu.memory_space<vmem>>, vector<1x128xf32>
    %15 = vector.broadcast %14 : vector<1x128xf32> to vector<128x128xf32>
    %16 = arith.addf %13, %15 : vector<128x128xf32>
    %cst_12 = arith.constant 0.000000e+00 : f32
    %17 = vector.broadcast %cst_12 : f32 to vector<128x128xf32>
    %18 = arith.cmpf ogt, %16, %17 : vector<128x128xf32>
    %cst_13 = arith.constant 2.000000e-01 : f32
    %19 = vector.broadcast %cst_13 : f32 to vector<128x128xf32>
    %20 = arith.mulf %19, %16 : vector<128x128xf32>
    %21 = arith.select %18, %16, %20 : vector<128x128xi1>, vector<128x128xf32>
    %22 = arith.truncf %21 : vector<128x128xf32> to vector<128x128xbf16>
    %c0_14 = arith.constant 0 : index
    %c0_15 = arith.constant 0 : index
    %23 = vector.load %arg6[%c0_14, %c0_15] : memref<128x128xbf16, #tpu.memory_space<vmem>>, vector<128x128xbf16>
    %cst_16 = arith.constant dense<0.000000e+00> : vector<128x128xf32>
    %24 = tpu.matmul %22, %23, %cst_16 {dimension_numbers = #tpu.dot_dimension_numbers<[1], [0], [0], [1], [0, 0, 1, 1], [], []>} : vector<128x128xbf16>, vector<128x128xbf16>, vector<128x128xf32> -> vector<128x128xf32>
    %c0_17 = arith.constant 0 : index
    %c0_18 = arith.constant 0 : index
    %25 = vector.load %arg7[%c0_17, %c0_18] : memref<1x128xf32, #tpu.memory_space<vmem>>, vector<1x128xf32>
    %26 = vector.broadcast %25 : vector<1x128xf32> to vector<128x128xf32>
    %27 = arith.addf %24, %26 : vector<128x128xf32>
    %c0_19 = arith.constant 0 : index
    %c0_20 = arith.constant 0 : index
    %28 = vector.load %arg8[%c0_19, %c0_20] : memref<128x128xf32, #tpu.memory_space<vmem>>, vector<128x128xf32>
    tpu.vector_store %arg8[%c0_19, %c0_20], %27 {strides = array<i32>} : memref<128x128xf32, #tpu.memory_space<vmem>>, vector<128x128xf32>,
    return
  }
  func.func @transform_0(%arg0: i32) -> (i32, i32) {
    %c0_i32 = arith.constant 0 : i32
    %c0_i32_0 = arith.constant 0 : i32
    return %arg0, %c0_i32 : i32, i32
  }
  func.func @transform_1(%arg0: i32) -> (i32, i32) {
    %c0_i32 = arith.constant 0 : i32
    %c0_i32_0 = arith.constant 0 : i32
    %c0_i32_1 = arith.constant 0 : i32
    return %c0_i32, %c0_i32_0 : i32, i32
  }
  func.func @transform_2(%arg0: i32) -> (i32, i32) {
    %c0_i32 = arith.constant 0 : i32
    %c0_i32_0 = arith.constant 0 : i32
    %c0_i32_1 = arith.constant 0 : i32
    return %c0_i32, %c0_i32_0 : i32, i32
  }
  func.func @transform_3(%arg0: i32) -> (i32, i32) {
    %c0_i32 = arith.constant 0 : i32
    %c0_i32_0 = arith.constant 0 : i32
    %c0_i32_1 = arith.constant 0 : i32
    return %c0_i32, %c0_i32_0 : i32, i32
  }
  func.func @transform_4(%arg0: i32) -> (i32, i32) {
    %c0_i32 = arith.constant 0 : i32
    %c0_i32_0 = arith.constant 0 : i32
    %c0_i32_1 = arith.constant 0 : i32
    return %c0_i32, %c0_i32_0 : i32, i32
  }
  func.func @transform_5(%arg0: i32) -> (i32, i32) {
    %c0_i32 = arith.constant 0 : i32
    %c0_i32_0 = arith.constant 0 : i32
    %c0_i32_1 = arith.constant 0 : i32
    return %c0_i32, %c0_i32_0 : i32, i32
  }
  func.func @transform_6(%arg0: i32) -> (i32, i32) {
    %c0_i32 = arith.constant 0 : i32
    %c0_i32_0 = arith.constant 0 : i32
    %c0_i32_1 = arith.constant 0 : i32
    return %c0_i32, %c0_i32_0 : i32, i32
  }
  func.func @transform_7(%arg0: i32) -> (i32, i32) {
    %c0_i32 = arith.constant 0 : i32
    %c0_i32_0 = arith.constant 0 : i32
    return %arg0, %c0_i32 : i32, i32
  }
}

</mosaic_0001>

<bundles_post_ra>
// kernel: tpu_custom_call.1
= control target key start
LH: loop header
LB: loop body
LE: loop exit
PB: predicated region body
PF: predicated region fallthrough
CT: control target
= control target key end

     0   :  { %12 = vsyncpa [#allocation3], 0  ;;  %s1604_s0 = inlined_call_operand.vmem [shape: bf16[256,32], index: 0, kind: input, shape index: {}]   ;;  %s1605_s1 = inlined_call_operand.vmem [shape: bf16[32,128], index: 1, kind: input, shape index: {}]   ;;  %s1606_s2 = inlined_call_operand.vmem [shape: f32[1,128], index: 2, kind: input, shape index: {}]   ;;  %s1607_s3 = inlined_call_operand.vmem [shape: bf16[128,128], index: 3, kind: input, shape index: {}]   ;;  %s1608_s4 = inlined_call_operand.vmem [shape: f32[1,128], index: 4, kind: input, shape index: {}]   ;;  %s1609_s5 = inlined_call_operand.vmem [shape: bf16[128,128], index: 5, kind: input, shape index: {}]   ;;  %s1610_s6 = inlined_call_operand.vmem [shape: f32[1,128], index: 6, kind: input, shape index: {}]   ;;  %s1611_s7 = inlined_call_operand.hbm [shape: f32[256,128], index: 7, kind: output, shape index: {}]  }
   0x1   :  { %14 = vsyncpa [#allocation3 + $0x1], 0  ;;  %s1372_s24 = smov 0   ;;  %s1374_s25 = smov 0  }
   0x2   :  { %s1376_s26 = smov 0   ;;  %s1378_s27 = smov 0  }
   0x3 LB: > { %s1393_s28 = sadd.s32 4294967295, %s1327_s27   ;;  %s1022_s29 = sadd.s32 4294967294, %s1327_s27   ;;  %s1327_s27 = sphi %s1378_s27, %s1617_s27   ;;  %s1323_s26 = sphi %s1376_s26, %s1616_s26   ;;  %s1319_s25 = sphi %s1374_s25, %s1615_s25   ;;  %s1315_s24 = sphi %s1372_s24, %s1614_s24  }
   0x4   : > { %s1397_s30 = sadd.s32 1, %s1327_s27   ;;  %s179_s8 = sadd.s32 1, %s1323_s26 }
   0x5   : > { %s176_s9 = ssub.s32 %s1327_s27, %s1397_s30  ;;  %p189_p0 = scmp.ne.s32.totalorder %s1323_s26, %s1319_s25 }
   0x6   : > { %p177_p1 = scmp.eq.s32.totalorder %s176_s9, 0  ;;  %p190_p2 = scmp.eq.s32.totalorder %s1393_s28, 1 }
   0x7   : > { %p195_p3 = scmp.ne.s32.totalorder %s1319_s25, %s1315_s24  ;;  %p196_p4 = scmp.eq.s32.totalorder %s1022_s29, 1 }
   0x8   : > { %s1408_s10 = scalar_select %p177_p1, %s1323_s26, %s179_s8  }
   0x9   : > { %p1410_p5 = por %p190_p2, %p189_p0  ;;  %p1414_p6 = por %p196_p4, %p195_p3 }
   0xa   : > { %p1025_p7 = scmp.ge.s32.totalorder %s1327_s27, 1  ;;  %p241_p8 = scmp.lt.s32.totalorder %s1327_s27, 3 }
   0xc   : > { %p242_p9 = pnand %p1025_p7, %p241_p8 }
   0xd   : > { %v1239_v0 = vld [vmem:[%s1605_s1] sm:$0xff] (!%p242_p9)   ;;  %s1027_s15 = sshll.u32 (!%p242_p9), %s1393_s28, 4  ;;  %v1240_v1 = vld [vmem:[%s1605_s1 + $0x8] sm:$0xff] (!%p242_p9)   ;;  %vm360_vm0 = vcmask (!%p242_p9), 261120   ;;  %v1251_v4 = vld [vmem:[%s1607_s3 + $0x10] sm:$0xff] (!%p242_p9)   ;;  %s270_s16 = sand.u32 (!%p242_p9), 1, %s1319_s25  }
   0xe   : > { %245 = sbr.rel (%p242_p9) target bundleno = 728 (0x2d8), region = 48  ;;  %p274_p10 = scmp.lt.s32.totalorder (!%p242_p9), %s1027_s15, 31  ;;  %1114 = vmatprep.subr.bf16.mxu0 (!%p242_p9), %v1239_v0  ;;  %v1249_v2 = vld [vmem:[%s1607_s3] sm:$0xff] (!%p242_p9)   ;;  %v1250_v3 = vld [vmem:[%s1607_s3 + $0x8] sm:$0xff] (!%p242_p9)   ;;  %v1252_v8 = vld [vmem:[%s1607_s3 + $0x18] sm:$0xff] (!%p242_p9)  }
   0xf   : > { %1115 = vmatpush3.bf16.msra.mxu0 (!%p242_p9), %v1239_v0  ;;  %1134 = vmatprep.subr.bf16.mxu1 (!%p242_p9), %v1249_v2  ;;  %v1253_v9 = vld [vmem:[%s1607_s3 + $0x20] sm:$0xff] (!%p242_p9)   ;;  %v1254_v15 = vld [vmem:[%s1607_s3 + $0x28] sm:$0xff] (!%p242_p9)   ;;  %v1255_v16 = vld [vmem:[%s1607_s3 + $0x30] sm:$0xff] (!%p242_p9)   ;;  %s1026_s17 = sshll.u32 (!%p242_p9), %s270_s16, 7  ;;  %s1071_s21 = sshll.u32 (!%p242_p9), %s1393_s28, 11 }
  0x10   : > { %1116 = vmatprep.subr.bf16.mxu0 (!%p242_p9), %v1240_v1  ;;  %1135 = vmatpush3.bf16.msra.mxu1 (!%p242_p9), %v1249_v2  ;;  %v1256_v17 = vld [vmem:[%s1607_s3 + $0x38] sm:$0xff] (!%p242_p9)   ;;  %v1257_v18 = vld [vmem:[%s1609_s5] sm:$0xff] (!%p242_p9)   ;;  %v1258_v19 = vld [vmem:[%s1609_s5 + $0x8] sm:$0xff] (!%p242_p9)   ;;  %s1534_s20 = scalar_lea.vmem (!%p242_p9), [#allocation2], %s1026_s17  ;;  %s1563_s28 = scalar_lea.sflag (!%p242_p9), [#allocation3], %s270_s16 }
  0x11   : > { %1136 = vmatprep.subr.bf16.mxu1 (!%p242_p9), %v1250_v3  ;;  %v1259_v20 = vld [vmem:[%s1609_s5 + $0x10] sm:$0xff] (!%p242_p9)   ;;  %v1260_v21 = vld [vmem:[%s1609_s5 + $0x18] sm:$0xff] (!%p242_p9)   ;;  %v1261_v22 = vld [vmem:[%s1609_s5 + $0x20] sm:$0xff] (!%p242_p9)   ;;  %s1329_s13 = smov (!%p242_p9), [#allocation2]  }
  0x12   : > { %v1262_v23 = vld [vmem:[%s1609_s5 + $0x28] sm:$0xff] (!%p242_p9)   ;;  %v1483_v24 = vld [vmem:[%s1606_s2] ss:$0 sm:$0xff] (!%p242_p9)  ;;  %s1269_s14 = sshll.u32 (!%p242_p9), %s1329_s13, 4  ;;  %s1270_s14 = int_to_ptr.vmem [resolvable:$false] %s1269_s14 }
  0x13   : > { %1117 = vmatpush3.bf16.msra.mxu0 (!%p242_p9), %v1240_v1 }
  0x14   : > { %1137 = vmatpush3.bf16.msra.mxu1 (!%p242_p9), %v1250_v3  ;;  %1166 = vmatprep.subr.bf16.mxu0 (!%p242_p9), %v1257_v18 }
  0x15   : > { %s1619_s15 = smov (!%p274_p10, %s1027_s15), 31  ;;  %1138 = vmatprep.subr.bf16.mxu1 %v1251_v4 }
  0x16   : > { %s1028_s22 = sshll.u32 %s1619_s15, 2  ;;  %s1271_s15 = scalar_lea.vmem %s1270_s14, 4096 }
  0x17   : > { %s277_s8 = scalar_lea.vmem %s1604_s0, %s1028_s22  ;;  %s960_s22 = sshll.u32 %s1534_s20, 4  ;;  %s1556_s22 = int_to_ptr.vmem [resolvable:$true] %s960_s22 }
  0x18   : > { %v1241_v5 = vld [vmem:[%s277_s8] sm:$0xff]   ;;  %v1242_v6 = vld [vmem:[%s277_s8 + $0x8] sm:$0xff]   ;;  %v1243_v7 = vld [vmem:[%s277_s8 + $0x10] sm:$0xff]   ;;  %1139 = vmatpush3.bf16.msra.mxu1 %v1251_v4  ;;  %s1265_s9 = scalar_lea.vmem %s1556_s22, 2048  ;;  %p1272_p0 = scmp.lt.s32.totalorder %s1556_s22, %s1270_s14 }
  0x19   : > { %1118 = vmatprep.mubr.msk.bf16.mxu0 %vm360_vm0, %v1241_v5  ;;  %v1244_v10 = vld [vmem:[%s277_s8 + $0x18] sm:$0xff]   ;;  %v1245_v11 = vld [vmem:[%s277_s8 + $0x20] sm:$0xff]   ;;  %1140 = vmatprep.subr.bf16.mxu1 %v1252_v8  ;;  %v1246_v12 = vld [vmem:[%s277_s8 + $0x28] sm:$0xff]   ;;  %p1266_p11 = scmp.ne.s32.totalorder %s1556_s22, %s1265_s9  ;;  %p1273_p1 = scmp.lt.s32.totalorder %s1271_s15, %s1265_s9 }
  0x1a   : > { %1119 = vmatmul.mubr.msk.bf16.vlgmr.msra.gmra.mrb[0].mxu0 %vm360_vm0, %v1242_v6  ;;  %v1247_v13 = vld [vmem:[%s277_s8 + $0x30] sm:$0xff]   ;;  %v1248_v14 = vld [vmem:[%s277_s8 + $0x38] sm:$0xff]   ;;  %s1554_s8 = scalar_lea.hbm %s1611_s7, %s1071_s21 }
  0x1b   : > { %1122 = vmatprep.mubr.msk.bf16.mxu0 %vm360_vm0, %v1243_v7  ;;  %1167 = vmatpush3.bf16.msra.mxu0 %v1257_v18  ;;  %p1267_p12 = pnand %p1266_p11, %p1410_p5  ;;  %p1274_p2 = por %p1273_p1, %p1272_p0 }
  0x1c   : > { %1141 = vmatpush3.bf16.msra.mxu1 %v1252_v8  ;;  %1168 = vmatprep.subr.bf16.mxu0 %v1258_v19 }
  0x1d   : > { %1142 = vmatprep.subr.bf16.mxu1 %v1253_v9  ;;  %p1268_p13 = pneg %p1267_p12 }
  0x1f   : > { %1169 = vmatpush3.bf16.msra.mxu0 %v1258_v19  ;;  %p1275_p3 = pnand %p1274_p2, %p1268_p13 }
  0x20   : > { %1143 = vmatpush3.bf16.msra.mxu1 %v1253_v9  ;;  %1170 = vmatprep.subr.bf16.mxu0 %v1259_v20 }
  0x21   : > { %1144 = vmatprep.subr.bf16.mxu1 %v1254_v15 }
  0x22   : > { %1123 = vmatmul.mubr.msk.bf16.gmra.mrb[4].mxu0 %vm360_vm0, %v1244_v10 }
  0x23   : > { %1126 = vmatprep.mubr.msk.bf16.mxu0 %vm360_vm0, %v1245_v11  ;;  %1171 = vmatpush3.bf16.msra.mxu0 %v1259_v20 }
  0x24   : > { %1145 = vmatpush3.bf16.msra.mxu1 %v1254_v15  ;;  %1172 = vmatprep.subr.bf16.mxu0 %v1260_v21 }
  0x25   : > { %1146 = vmatprep.subr.bf16.mxu1 %v1255_v16 }
  0x27   : > { %1173 = vmatpush3.bf16.msra.mxu0 %v1260_v21 }
  0x28   : > { %1147 = vmatpush3.bf16.msra.mxu1 %v1255_v16  ;;  %1174 = vmatprep.subr.bf16.mxu0 %v1261_v22 }
  0x29   : > { %1148 = vmatprep.subr.bf16.mxu1 %v1256_v17 }
  0x2a   : > { %1127 = vmatmul.mubr.msk.bf16.gmra.mrb[8].mxu0 %vm360_vm0, %v1246_v12 }
  0x2b   : > { %1130 = vmatprep.mubr.msk.bf16.mxu0 %vm360_vm0, %v1247_v13  ;;  %1175 = vmatpush3.bf16.msra.mxu0 %v1261_v22 }
  0x2c   : > { %1149 = vmatpush3.bf16.msra.mxu1 %v1256_v17  ;;  %1176 = vmatprep.subr.bf16.mxu0 %v1262_v23 }
  0x2f   : > { %1177 = vmatpush3.bf16.msra.mxu0 %v1262_v23 }
  0x32   : > { %1131 = vmatmul.mubr.msk.bf16.gmra.mrb[12].mxu0 %vm360_vm0, %v1248_v14 }
  0xed   : > { %v1120_v25 = vpop.f32.mrb[0].mxu0 }
  0xee   : > { %v428_v26 = vadd.f32 %v1120_v25, %v1483_v24  ;;  %v419_v27 = vpop.f32.mrb[1].mxu0 }
  0xef   : > { %v420_v28 = vadd.f32 %v1483_v24, %v419_v27  ;;  %v1121_v29 = vpop.f32.mrb[2].mxu0 }
  0xf0   : > { %v500_v30 = vmul.f32 0.2, %v428_v26  ;;  %v431_v31 = vadd.f32 %v1121_v29, %v1483_v24  ;;  %v422_v32 = vpop.f32.mrb[3].mxu0  ;;  %vm484_vm1 = vcmp.gt.f32.partialorder %v428_v26, 0.0 }
  0xf1   : > { %v498_v33 = vmul.f32 0.2, %v420_v28  ;;  %v423_v34 = vadd.f32 %v1483_v24, %v422_v32  ;;  %vm482_vm3 = vcmp.gt.f32.partialorder %v420_v28, 0.0 }
  0xf2   : > { %vm485_vm2 = vcmp.gt.f32.partialorder %v431_v31, 0.0  ;;  %v501_v35 = vmul.f32 0.2, %v431_v31  ;;  %v516_v37 = vsel %vm484_vm1, %v428_v26, %v500_v30 }
  0xf3   : > { %v499_v36 = vmul.f32 0.2, %v423_v34  ;;  %vm483_vm4 = vcmp.gt.f32.partialorder %v423_v34, 0.0  ;;  %v514_v40 = vsel %vm482_vm3, %v420_v28, %v498_v33 }
  0xf4   : > { %v517_v38 = vsel %vm485_vm2, %v431_v31, %v501_v35  ;;  %v1510_v35 = vld [vmem:[%s1608_s4] ss:$0 sm:$0xff] }
  0xf5   : > { %v1124_v39 = vpop.f32.mrb[4].mxu0  ;;  %v515_v41 = vsel %vm483_vm4, %v423_v34, %v499_v36  ;;  %v531_v42 = vpack.c.bf16 %v517_v38, %v516_v37  ;;  %v1263_v34 = vld [vmem:[%s1609_s5 + $0x30] sm:$0xff]  }
  0xf6   : > { %v444_v43 = vadd.f32 %v1124_v39, %v1483_v24  ;;  %v435_v44 = vpop.f32.mrb[5].mxu0  ;;  %v530_v45 = vpack.c.bf16 %v515_v41, %v514_v40  ;;  %1178 = vmatprep.subr.bf16.mxu0 %v1263_v34 }
  0xf7   : > { %v436_v46 = vadd.f32 %v1483_v24, %v435_v44  ;;  %v1125_v47 = vpop.f32.mrb[6].mxu0  ;;  %1179 = vmatpush3.bf16.msra.mxu0 %v1263_v34 }
  0xf8   : > { %v504_v48 = vmul.f32 0.2, %v444_v43  ;;  %v447_v49 = vadd.f32 %v1125_v47, %v1483_v24  ;;  %v438_v50 = vpop.f32.mrb[7].mxu0  ;;  %1150 = vmatprep.mubr.bf16.mxu1 %v530_v45  ;;  %vm488_vm5 = vcmp.gt.f32.partialorder %v444_v43, 0.0 }
  0xf9   : > { %v502_v51 = vmul.f32 0.2, %v436_v46  ;;  %v439_v52 = vadd.f32 %v1483_v24, %v438_v50  ;;  %1151 = vmatmul.mubr.bf16.vlgmr.msra.gmra.mrb[0].mxu1 %v531_v42  ;;  %vm486_vm6 = vcmp.gt.f32.partialorder %v436_v46, 0.0 }
  0xfa   : > { %vm489_vm7 = vcmp.gt.f32.partialorder %v447_v49, 0.0  ;;  %v505_v53 = vmul.f32 0.2, %v447_v49  ;;  %v520_v55 = vsel %vm488_vm5, %v444_v43, %v504_v48 }
  0xfb   : > { %vm487_vm8 = vcmp.gt.f32.partialorder %v439_v52, 0.0  ;;  %v503_v54 = vmul.f32 0.2, %v439_v52  ;;  %v518_v58 = vsel %vm486_vm6, %v436_v46, %v502_v51 }
  0xfc   : > { %v521_v56 = vsel %vm489_vm7, %v447_v49, %v505_v53 }
  0xfd   : > { %v1128_v57 = vpop.f32.mrb[8].mxu0  ;;  %v519_v59 = vsel %vm487_vm8, %v439_v52, %v503_v54  ;;  %v533_v60 = vpack.c.bf16 %v521_v56, %v520_v55 }
  0xfe   : > { %v460_v61 = vadd.f32 %v1128_v57, %v1483_v24  ;;  %v451_v62 = vpop.f32.mrb[9].mxu0  ;;  %v532_v63 = vpack.c.bf16 %v519_v59, %v518_v58 }
  0xff   : > { %v452_v0 = vadd.f32 %v1483_v24, %v451_v62  ;;  %v1129_v1 = vpop.f32.mrb[10].mxu0 }
 0x100   : > { %v508_v2 = vmul.f32 0.2, %v460_v61  ;;  %v463_v3 = vadd.f32 %v1129_v1, %v1483_v24  ;;  %v454_v4 = vpop.f32.mrb[11].mxu0  ;;  %1154 = vmatprep.mubr.bf16.mxu1 %v532_v63  ;;  %vm492_vm9 = vcmp.gt.f32.partialorder %v460_v61, 0.0 }
 0x101   : > { %v506_v5 = vmul.f32 0.2, %v452_v0  ;;  %v455_v6 = vadd.f32 %v1483_v24, %v454_v4  ;;  %1155 = vmatmul.mubr.bf16.gmra.mrb[4].mxu1 %v533_v60  ;;  %vm490_vm10 = vcmp.gt.f32.partialorder %v452_v0, 0.0 }
 0x102   : > { %vm493_vm11 = vcmp.gt.f32.partialorder %v463_v3, 0.0  ;;  %v509_v7 = vmul.f32 0.2, %v463_v3  ;;  %v524_v9 = vsel %vm492_vm9, %v460_v61, %v508_v2 }
 0x103   : > { %vm491_vm12 = vcmp.gt.f32.partialorder %v455_v6, 0.0  ;;  %v507_v8 = vmul.f32 0.2, %v455_v6  ;;  %v522_v12 = vsel %vm490_vm10, %v452_v0, %v506_v5 }
 0x104   : > { %v525_v10 = vsel %vm493_vm11, %v463_v3, %v509_v7 }
 0x105   : > { %v1132_v11 = vpop.f32.mrb[12].mxu0  ;;  %v523_v13 = vsel %vm491_vm12, %v455_v6, %v507_v8  ;;  %v535_v14 = vpack.c.bf16 %v525_v10, %v524_v9 }
 0x106   : > { %v476_v15 = vadd.f32 %v1132_v11, %v1483_v24  ;;  %v467_v16 = vpop.f32.mrb[13].mxu0  ;;  %v534_v17 = vpack.c.bf16 %v523_v13, %v522_v12 }
 0x107   : > { %v468_v18 = vadd.f32 %v1483_v24, %v467_v16  ;;  %v1133_v19 = vpop.f32.mrb[14].mxu0 }
 0x108   : > { %v512_v20 = vmul.f32 0.2, %v476_v15  ;;  %v479_v21 = vadd.f32 %v1133_v19, %v1483_v24  ;;  %v470_v22 = vpop.f32.mrb[15].mxu0  ;;  %1158 = vmatprep.mubr.bf16.mxu1 %v534_v17  ;;  %vm496_vm13 = vcmp.gt.f32.partialorder %v476_v15, 0.0 }
 0x109   : > { %v510_v23 = vmul.f32 0.2, %v468_v18  ;;  %v471_v25 = vadd.f32 %v1483_v24, %v470_v22  ;;  %1159 = vmatmul.mubr.bf16.gmra.mrb[8].mxu1 %v535_v14  ;;  %vm494_vm14 = vcmp.gt.f32.partialorder %v468_v18, 0.0  ;;  %v1264_v24 = vld [vmem:[%s1609_s5 + $0x38] sm:$0xff]  }
 0x10a   : > { %vm497_vm15 = vcmp.gt.f32.partialorder %v479_v21, 0.0  ;;  %v513_v26 = vmul.f32 0.2, %v479_v21  ;;  %v528_v28 = vsel %vm496_vm13, %v476_v15, %v512_v20  ;;  %1180 = vmatprep.subr.bf16.mxu0 %v1264_v24 }
 0x10b   : > { %vm495_vm0 = vcmp.gt.f32.partialorder %v471_v25, 0.0  ;;  %v511_v27 = vmul.f32 0.2, %v471_v25  ;;  %v526_v30 = vsel %vm494_vm14, %v468_v18, %v510_v23  ;;  %1181 = vmatpush3.bf16.msra.mxu0 %v1264_v24 }
 0x10c   : > { %v529_v29 = vsel %vm497_vm15, %v479_v21, %v513_v26 }
 0x10d   : > { %v527_v31 = vsel %vm495_vm0, %v471_v25, %v511_v27  ;;  %v537_v32 = vpack.c.bf16 %v529_v29, %v528_v28 }
 0x10e   : > { %v536_v33 = vpack.c.bf16 %v527_v31, %v526_v30 }
 0x110   : > { %1162 = vmatprep.mubr.bf16.mxu1 %v536_v33 }
 0x111   : > { %1163 = vmatmul.mubr.bf16.gmra.mrb[12].mxu1 %v537_v32 }
 0x1cc   : > { %v1152_v36 = vpop.f32.mrb[0].mxu1 }
 0x1cd   : > { %v652_v37 = vadd.f32 %v1152_v36, %v1510_v35  ;;  %v643_v38 = vpop.f32.mrb[1].mxu1 }
 0x1ce   : > { %v644_v39 = vadd.f32 %v1510_v35, %v643_v38  ;;  %v1153_v40 = vpop.f32.mrb[2].mxu1 }
 0x1cf   : > { %v724_v41 = vmul.f32 0.2, %v652_v37  ;;  %v655_v42 = vadd.f32 %v1153_v40, %v1510_v35  ;;  %v646_v43 = vpop.f32.mrb[3].mxu1  ;;  %vm708_vm1 = vcmp.gt.f32.partialorder %v652_v37, 0.0 }
 0x1d0   : > { %v722_v44 = vmul.f32 0.2, %v644_v39  ;;  %v647_v45 = vadd.f32 %v1510_v35, %v646_v43  ;;  %vm706_vm2 = vcmp.gt.f32.partialorder %v644_v39, 0.0 }
 0x1d1   : > { %vm709_vm3 = vcmp.gt.f32.partialorder %v655_v42, 0.0  ;;  %v725_v46 = vmul.f32 0.2, %v655_v42  ;;  %v740_v48 = vsel %vm708_vm1, %v652_v37, %v724_v41 }
 0x1d2   : > { %vm707_vm4 = vcmp.gt.f32.partialorder %v647_v45, 0.0  ;;  %v723_v47 = vmul.f32 0.2, %v647_v45  ;;  %v738_v52 = vsel %vm706_vm2, %v644_v39, %v722_v44 }
 0x1d3   : > { %v741_v49 = vsel %vm709_vm3, %v655_v42, %v725_v46 }
 0x1d4   : > { %v755_v50 = vpack.c.bf16 %v741_v49, %v740_v48  ;;  %v1156_v51 = vpop.f32.mrb[4].mxu1  ;;  %v739_v53 = vsel %vm707_vm4, %v647_v45, %v723_v47 }
 0x1d5   : > { %v668_v54 = vadd.f32 %v1156_v51, %v1510_v35  ;;  %v659_v55 = vpop.f32.mrb[5].mxu1  ;;  %v754_v56 = vpack.c.bf16 %v739_v53, %v738_v52 }
 0x1d6   : > { %v660_v57 = vadd.f32 %v1510_v35, %v659_v55  ;;  %v1157_v58 = vpop.f32.mrb[6].mxu1 }
 0x1d7   : > { %v728_v59 = vmul.f32 0.2, %v668_v54  ;;  %v671_v60 = vadd.f32 %v1157_v58, %v1510_v35  ;;  %v662_v61 = vpop.f32.mrb[7].mxu1  ;;  %1182 = vmatprep.mubr.bf16.mxu0 %v754_v56  ;;  %vm712_vm5 = vcmp.gt.f32.partialorder %v668_v54, 0.0 }
 0x1d8   : > { %v726_v62 = vmul.f32 0.2, %v660_v57  ;;  %v663_v63 = vadd.f32 %v1510_v35, %v662_v61  ;;  %1183 = vmatmul.mubr.bf16.vlgmr.msra.gmra.mrb[16].mxu0 %v755_v50  ;;  %vm710_vm6 = vcmp.gt.f32.partialorder %v660_v57, 0.0 }
 0x1d9   : > { %vm713_vm7 = vcmp.gt.f32.partialorder %v671_v60, 0.0  ;;  %v729_v0 = vmul.f32 0.2, %v671_v60  ;;  %v744_v2 = vsel %vm712_vm5, %v668_v54, %v728_v59 }
 0x1da   : > { %vm711_vm8 = vcmp.gt.f32.partialorder %v663_v63, 0.0  ;;  %v727_v1 = vmul.f32 0.2, %v663_v63  ;;  %v742_v5 = vsel %vm710_vm6, %v660_v57, %v726_v62 }
 0x1db   : > { %v745_v3 = vsel %vm713_vm7, %v671_v60, %v729_v0 }
 0x1dc   : > { %v1160_v4 = vpop.f32.mrb[8].mxu1  ;;  %v743_v6 = vsel %vm711_vm8, %v663_v63, %v727_v1  ;;  %v757_v7 = vpack.c.bf16 %v745_v3, %v744_v2 }
 0x1dd   : > { %v684_v8 = vadd.f32 %v1160_v4, %v1510_v35  ;;  %v675_v9 = vpop.f32.mrb[9].mxu1  ;;  %v756_v10 = vpack.c.bf16 %v743_v6, %v742_v5 }
 0x1de   : > { %v676_v11 = vadd.f32 %v1510_v35, %v675_v9  ;;  %v1161_v12 = vpop.f32.mrb[10].mxu1 }
 0x1df   : > { %v732_v13 = vmul.f32 0.2, %v684_v8  ;;  %v687_v14 = vadd.f32 %v1161_v12, %v1510_v35  ;;  %v678_v15 = vpop.f32.mrb[11].mxu1  ;;  %1186 = vmatprep.mubr.bf16.mxu0 %v756_v10  ;;  %vm716_vm9 = vcmp.gt.f32.partialorder %v684_v8, 0.0 }
 0x1e0   : > { %v730_v16 = vmul.f32 0.2, %v676_v11  ;;  %v679_v17 = vadd.f32 %v1510_v35, %v678_v15  ;;  %1187 = vmatmul.mubr.bf16.gmra.mrb[20].mxu0 %v757_v7  ;;  %vm714_vm10 = vcmp.gt.f32.partialorder %v676_v11, 0.0 }
 0x1e1   : > { %vm717_vm11 = vcmp.gt.f32.partialorder %v687_v14, 0.0  ;;  %v733_v18 = vmul.f32 0.2, %v687_v14  ;;  %v748_v20 = vsel %vm716_vm9, %v684_v8, %v732_v13 }
 0x1e2   : > { %vm715_vm12 = vcmp.gt.f32.partialorder %v679_v17, 0.0  ;;  %v731_v19 = vmul.f32 0.2, %v679_v17  ;;  %v746_v23 = vsel %vm714_vm10, %v676_v11, %v730_v16 }
 0x1e3   : > { %v749_v21 = vsel %vm717_vm11, %v687_v14, %v733_v18 }
 0x1e4   : > { %v1164_v22 = vpop.f32.mrb[12].mxu1  ;;  %v747_v25 = vsel %vm715_vm12, %v679_v17, %v731_v19  ;;  %v759_v26 = vpack.c.bf16 %v749_v21, %v748_v20 }
 0x1e5   : > { %v700_v27 = vadd.f32 %v1164_v22, %v1510_v35  ;;  %v691_v28 = vpop.f32.mrb[13].mxu1  ;;  %v758_v29 = vpack.c.bf16 %v747_v25, %v746_v23 }
 0x1e6   : > { %v692_v30 = vadd.f32 %v1510_v35, %v691_v28  ;;  %v1165_v31 = vpop.f32.mrb[14].mxu1 }
 0x1e7   : > { %v736_v32 = vmul.f32 0.2, %v700_v27  ;;  %v703_v33 = vadd.f32 %v1165_v31, %v1510_v35  ;;  %v694_v34 = vpop.f32.mrb[15].mxu1  ;;  %1190 = vmatprep.mubr.bf16.mxu0 %v758_v29  ;;  %vm720_vm13 = vcmp.gt.f32.partialorder %v700_v27, 0.0 }
 0x1e8   : > { %v734_v24 = vmul.f32 0.2, %v692_v30  ;;  %v695_v36 = vadd.f32 %v1510_v35, %v694_v34  ;;  %1191 = vmatmul.mubr.bf16.gmra.mrb[24].mxu0 %v759_v26  ;;  %vm718_vm14 = vcmp.gt.f32.partialorder %v692_v30, 0.0  ;;  %v1057_v35 = vld [vmem:[%s1610_s6] ss:$0 sm:$0xff] }
 0x1e9   : > { %vm721_vm15 = vcmp.gt.f32.partialorder %v703_v33, 0.0  ;;  %v737_v37 = vmul.f32 0.2, %v703_v33  ;;  %v752_v39 = vsel %vm720_vm13, %v700_v27, %v736_v32 }
 0x1ea   : > { %vm719_vm0 = vcmp.gt.f32.partialorder %v695_v36, 0.0  ;;  %v735_v38 = vmul.f32 0.2, %v695_v36  ;;  %v750_v41 = vsel %vm718_vm14, %v692_v30, %v734_v24 }
 0x1eb   : > { %v753_v40 = vsel %vm721_vm15, %v703_v33, %v737_v37 }
 0x1ec   : > { %v751_v42 = vsel %vm719_vm0, %v695_v36, %v735_v38  ;;  %v761_v43 = vpack.c.bf16 %v753_v40, %v752_v39 }
 0x1ed   : > { %v760_v44 = vpack.c.bf16 %v751_v42, %v750_v41 }
 0x1ef   : > { %1194 = vmatprep.mubr.bf16.mxu0 %v760_v44 }
 0x1f0   : > { %1195 = vmatmul.mubr.bf16.gmra.mrb[28].mxu0 %v761_v43 }
 0x2ab   : > { %v1184_v45 = vpop.f32.mrb[16].mxu0 }
 0x2ac   : > { %v876_v46 = vadd.f32 %v1184_v45, %v1057_v35  ;;  %v867_v47 = vpop.f32.mrb[17].mxu0 }
 0x2ad   : > { %v868_v48 = vadd.f32 %v1057_v35, %v867_v47  ;;  %v1185_v49 = vpop.f32.mrb[18].mxu0 }
 0x2ae   : > { %932 = vst [vmem:[%s1534_s20 + $0x10] sm:$0xff] %v876_v46  ;;  %v879_v50 = vadd.f32 %v1185_v49, %v1057_v35  ;;  %v870_v51 = vpop.f32.mrb[19].mxu0 }
 0x2af   : > { %930 = vst [vmem:[%s1534_s20] sm:$0xff] %v868_v48  ;;  %v871_v52 = vadd.f32 %v1057_v35, %v870_v51 }
 0x2b0   : > { %933 = vst [vmem:[%s1534_s20 + $0x18] sm:$0xff] %v879_v50 }
 0x2b1   : > { %931 = vst [vmem:[%s1534_s20 + $0x8] sm:$0xff] %v871_v52 }
 0x2b3   : > { %v1188_v53 = vpop.f32.mrb[20].mxu0 }
 0x2b4   : > { %v892_v54 = vadd.f32 %v1188_v53, %v1057_v35  ;;  %v883_v55 = vpop.f32.mrb[21].mxu0 }
 0x2b5   : > { %v884_v56 = vadd.f32 %v1057_v35, %v883_v55  ;;  %v1189_v57 = vpop.f32.mrb[22].mxu0 }
 0x2b6   : > { %936 = vst [vmem:[%s1534_s20 + $0x30] sm:$0xff] %v892_v54  ;;  %v895_v58 = vadd.f32 %v1189_v57, %v1057_v35  ;;  %v886_v59 = vpop.f32.mrb[23].mxu0 }
 0x2b7   : > { %934 = vst [vmem:[%s1534_s20 + $0x20] sm:$0xff] %v884_v56  ;;  %v887_v60 = vadd.f32 %v1057_v35, %v886_v59 }
 0x2b8   : > { %937 = vst [vmem:[%s1534_s20 + $0x38] sm:$0xff] %v895_v58 }
 0x2b9   : > { %935 = vst [vmem:[%s1534_s20 + $0x28] sm:$0xff] %v887_v60 }
 0x2bb   : > { %v1192_v61 = vpop.f32.mrb[24].mxu0 }
 0x2bc   : > { %v908_v62 = vadd.f32 %v1192_v61, %v1057_v35  ;;  %v899_v63 = vpop.f32.mrb[25].mxu0 }
 0x2bd   : > { %v900_v0 = vadd.f32 %v1057_v35, %v899_v63  ;;  %v1193_v1 = vpop.f32.mrb[26].mxu0 }
 0x2be   : > { %940 = vst [vmem:[%s1534_s20 + $0x50] sm:$0xff] %v908_v62  ;;  %v911_v2 = vadd.f32 %v1193_v1, %v1057_v35  ;;  %v902_v3 = vpop.f32.mrb[27].mxu0 }
 0x2bf   : > { %938 = vst [vmem:[%s1534_s20 + $0x40] sm:$0xff] %v900_v0  ;;  %v903_v4 = vadd.f32 %v1057_v35, %v902_v3 }
 0x2c0   : > { %941 = vst [vmem:[%s1534_s20 + $0x58] sm:$0xff] %v911_v2 }
 0x2c1   : > { %939 = vst [vmem:[%s1534_s20 + $0x48] sm:$0xff] %v903_v4 }
 0x2c3   : > { %v1196_v5 = vpop.f32.mrb[28].mxu0 }
 0x2c4   : > { %v924_v6 = vadd.f32 %v1196_v5, %v1057_v35  ;;  %v915_v7 = vpop.f32.mrb[29].mxu0 }
 0x2c5   : > { %v916_v8 = vadd.f32 %v1057_v35, %v915_v7  ;;  %v1197_v9 = vpop.f32.mrb[30].mxu0 }
 0x2c6   : > { %944 = vst [vmem:[%s1534_s20 + $0x70] sm:$0xff] %v924_v6  ;;  %v927_v10 = vadd.f32 %v1197_v9, %v1057_v35  ;;  %v918_v11 = vpop.f32.mrb[31].mxu0 }
 0x2c7   : > { %942 = vst [vmem:[%s1534_s20 + $0x60] sm:$0xff] %v916_v8  ;;  %v919_v12 = vadd.f32 %v1057_v35, %v918_v11 }
 0x2c8   : > { %945 = vst [vmem:[%s1534_s20 + $0x78] sm:$0xff] %v927_v10 }
 0x2c9   : > { %943 = vst [vmem:[%s1534_s20 + $0x68] sm:$0xff] %v919_v12 }
 0x2ca   : > { %1278 = shalt.err (!%p1275_p3)
}
 0x2cb   : > { %s1279_s16 = scalar_lea.hbm %s1554_s8, 2048  ;;  %s1283_s19 = scalar_lea.hbm %s1611_s7, 4096 }
 0x2cc   : > { %p1280_p4 = scmp.ne.s32.totalorder %s1554_s8, %s1279_s16  ;;  %p1284_p9 = scmp.lt.u32.totalorder %s1554_s8, %s1611_s7 }
 0x2cd   : > { %p1285_p10 = scmp.lt.u32.totalorder %s1283_s19, %s1279_s16  ;;  %p1287_p12 = scmp.lt.u32.totalorder %s1279_s16, %s1554_s8 }
 0x2ce   : > { %p1281_p7 = pnand %p1280_p4, %p1410_p5 }
 0x2cf   : > { %p1286_p11 = por %p1285_p10, %p1284_p9 }
 0x2d0   : > { %p1282_p8 = pneg %p1281_p7 }
 0x2d1   : > { %p1288_p13 = por %p1287_p12, %p1286_p11 }
 0x2d3   : > { %p1289_p0 = pnand %p1288_p13, %p1282_p8 }
 0x2d5   : > { %1292 = shalt.err (!%p1289_p0)
}
 0x2d6   : > { %s1330_s23 = smov 128   ;;  %s1331_s29 = smov 8  }
 0x2d7   : > { %1198 = dma.vmem_to_hbm [thread:$0]  (%p1410_p5), %s1556_s22, 2048, %s1554_s8, %s1563_s28, %s1330_s23, %s1330_s23, %s1331_s29  }
 0x2d8 PF: > { %p1204_p1 = scmp.ge.s32.totalorder %s1327_s27, 2  ;;  %s975_s9 = sand.u32 1, %s1315_s24  }
 0x2d9   : > { %s976_s13 = scalar_lea.sflag [#allocation3], %s975_s9 }
 0x2da   : > { %p1201_p2 = pnand %p1204_p1, %p1414_p6 }
 0x2dc   : > { %1310 = dma.done.wait (!%p1201_p2), %s976_s13, 2048  }
 0x2dd   : > { %1312 = vsyncadd (!%p1201_p2), %s976_s13, 4294965248  ;;  %p17_p3 = scmp.ge.s32.totalorder %s1397_s30, 4   ;;  %s1614_s24 = smov %s1319_s25 }
 0x2de   : > { %s1615_s25 = smov %s1323_s26  ;;  %s1616_s26 = smov %s1408_s10 }
 0x2df   : > { %s1617_s27 = smov %s1397_s30  ;;  %19 = sbr.rel (!%p17_p3) target bundleno = 3 (0x3), region = 83 }
 0x2e6   :  { %981 = vsyncpa [#allocation3], 1 }
 0x2e7   :  { %983 = vsyncpa [#allocation3 + $0x1], 1 }

</bundles_post_ra>
